<compile_context>
chip_gen: v7x
topology: tpu7x:2x2x1
jax: 0.10.0
libtpu: 0.0.40
codegen_flags: <defaults>
</compile_context>

<pallas_src>
import functools
import math

import jax
import jax.numpy as jnp
from jax.experimental import pallas as pl
from jax.experimental.pallas import tpu as pltpu


def _smooth_ce_kernel(pred_ref, gold_ref, out_ref, *, smoothing: float,
                      n_total: int, tile_n: int):
    i = pl.program_id(0)

    pred_nat = pred_ref[...]           # (tn, C), native dtype
    gold = gold_ref[...]               # (tn, 1), int32
    tn, c = pred_nat.shape

    # Smoothing constants (Python floats, folded at trace time).  Guard the
    # degenerate C == 1 and smoothing in {0, 1} cases so 0*log(0) never appears.
    off = smoothing / (c - 1) if c > 1 else 0.0
    on = 1.0 - smoothing
    const = 0.0
    if on > 0.0:
        const += on * math.log(on)
    if off > 0.0:
        const += (c - 1) * off * math.log(off)

    # Row max in native dtype (bf16 VALU on v6e/v7x); everything else in f32.
    m = jnp.max(pred_nat, axis=1, keepdims=True).astype(jnp.float32)      # (tn,1)
    pred = pred_nat.astype(jnp.float32)                                   # (tn,C)

    # Row-wise pieces, computed on pred directly (no `z = pred - m` temporary).
    sum_pred = jnp.sum(pred, axis=1, keepdims=True)                       # (tn,1)
    col_ids = jax.lax.broadcasted_iota(jnp.int32, (tn, c), 1)
    # Scatter-free gather of pred[gold] via lane-iota compare.
    # NOTE: out-of-range gold (<0 or >=C) silently yields pred_gold = 0 instead
    # of raising like PyTorch's scatter_/indexing would.
    pred_gold = jnp.sum(jnp.where(col_ids == gold, pred, 0.0),
                        axis=1, keepdims=True)                            # (tn,1)
    # Only full-tile transcendental; the subtraction is fused into exp's input.
    lse = m + jnp.log(jnp.sum(jnp.exp(pred - m), axis=1, keepdims=True))  # (tn,1)

    sum_log_prob = sum_pred - c * lse        # sum_c log_softmax(pred)
    logp_gold = pred_gold - lse              # log_softmax(pred)[gold]

    per_row = const - off * sum_log_prob - (on - off) * logp_gold         # (tn,1)

    # Mask padded remainder rows: rows past N come from the Pallas-padded block
    # and whatever they contain (even NaN/Inf) is dropped by this select.
    row_ids = jax.lax.broadcasted_iota(jnp.int32, (tn, 1), 0) + i * tile_n
    per_row = jnp.where(row_ids < n_total, per_row, 0.0)

    # Per-tile partial sum, written as one lane-dense (8,128) vreg (unmasked
    # vst, tiny writeback).  Wrapper reads element [i, 0, 0].
    tile_sum = jnp.sum(per_row)
    out_ref[...] = jnp.broadcast_to(tile_sum, (1, 8, 128)).astype(jnp.float32)


def smooth_cross_entropy(pred: jax.Array, gold: jax.Array,
                         smoothing: float = 0.1,
                         stream_bf16: bool = False) -> jax.Array:
    """Pallas TPU implementation of SmoothCrossEntropy.forward (scalar loss)."""
    assert pred.ndim == 2, "pred must be (N, C)"
    n, c = pred.shape
    gold2d = gold.astype(jnp.int32).reshape(n, 1)

    if stream_bf16 and pred.dtype == jnp.float32:
        # Bandwidth lever for f32 callers: halve HBM bytes; in-kernel math is f32.
        pred = pred.astype(jnp.bfloat16)

    itemsize = pred.dtype.itemsize
    # Sub-32-bit dtypes pack along sublanes: bf16 min tile is (16,128), int8 (32,128).
    row_align = {4: 8, 2: 16, 1: 32}.get(itemsize, 8)

    # Generation-aware VMEM capacity (v5e/v6e: 128 MiB, v7x: 64 MiB per TC).
    try:
        vmem_cap = int(pltpu.get_tpu_info().vmem_capacity_bytes)
    except Exception:
        vmem_cap = 64 * 1024 * 1024

    # Per-row VMEM footprint estimate (lanes padded to 128):
    #   2 native pred buffers (double-buffered input)
    # + ~2 full-tile f32 temporaries inside the kernel (upcast + exp path)
    # + 2 gold buffers (int32, lane-padded).
    c_pad = ((c + 127) // 128) * 128
    row_vmem = 2 * c_pad * itemsize + 2 * c_pad * 4 + 2 * 128 * 4
    budget = min(vmem_cap // 2, 48 * 1024 * 1024)
    tile_n = max(row_align, (budget // row_vmem) // row_align * row_align)
    # TODO(synk): very large class counts (one row's working set ~ budget) would
    # need class-axis tiling with an online max/LSE accumulator; not done here.

    if tile_n >= n:
        tile_n = n
        # Split medium/large batches into >=2 tiles so the "parallel" grid axis
        # can shard across v7x's two TensorCores (no effect on v5e/v6e).
        if n >= 2 * row_align and n * c * itemsize >= (2 << 20):
            half = (((n + 1) // 2 + row_align - 1) // row_align) * row_align
            if half < n:
                tile_n = half
    num_tiles = pl.cdiv(n, tile_n)

    # Keep the requested scoped-VMEM limit under the physical cap (v7x: 64 MiB).
    est_vmem = tile_n * row_vmem + (4 << 20)
    vmem_limit = int(min(max(est_vmem, 32 << 20), vmem_cap - (8 << 20)))

    kernel = functools.partial(_smooth_ce_kernel, smoothing=float(smoothing),
                               n_total=n, tile_n=tile_n)

    cost = pl.CostEstimate(
        flops=int(6 * n * c + 8 * n),
        transcendentals=int(n * c + 2 * n),
        bytes_accessed=int(n * c * itemsize + n * 4 + num_tiles * 8 * 128 * 4),
    )

    partials = pl.pallas_call(
        kernel,
        out_shape=jax.ShapeDtypeStruct((num_tiles, 8, 128), jnp.float32),
        grid=(num_tiles,),
        in_specs=[
            pl.BlockSpec((tile_n, c), lambda i: (i, 0)),   # pred, native dtype
            pl.BlockSpec((tile_n, 1), lambda i: (i, 0)),   # gold indices
        ],
        out_specs=pl.BlockSpec((1, 8, 128), lambda i: (i, 0, 0)),
        compiler_params=pltpu.CompilerParams(
            dimension_semantics=("parallel",),
            vmem_limit_bytes=vmem_limit,
        ),
        cost_estimate=cost,
    )(pred, gold2d)

    # Tiny final reduction (one scalar per tile) + mean over the true batch size.
    return jnp.sum(partials[:, 0, 0]) / n


def _reference(pred, gold, smoothing=0.1):
    n, c = pred.shape
    one_hot = jnp.full((n, c), smoothing / (c - 1), dtype=jnp.float32)
    one_hot = one_hot.at[jnp.arange(n), gold].set(1.0 - smoothing)
    log_prob = jax.nn.log_softmax(pred.astype(jnp.float32), axis=1)
    kl = one_hot * (jnp.log(one_hot) - log_prob)
    return jnp.mean(jnp.sum(kl, axis=1))


if __name__ == "__main__":
    key = jax.random.PRNGKey(0)
    k_pred, k_gold = jax.random.split(key)

    N, C = 8, 32
    pred = jax.random.normal(k_pred, (N, C), dtype=jnp.float32)
    gold = jax.random.randint(k_gold, (N,), 0, C, dtype=jnp.int32)

    loss = smooth_cross_entropy(pred, gold, smoothing=0.1)
    loss = jax.block_until_ready(loss)

    ref = _reference(pred, gold, smoothing=0.1)
    assert jnp.allclose(loss, ref, rtol=1e-5, atol=1e-5), (loss, ref)

    print("KERNEL_OK")
</pallas_src>

<mosaic_0001>
module attributes {stable_mosaic.version = 11 : i64} {
  func.func @_smooth_ce_kernel(%arg0: i32, %arg1: memref<8x32xf32, #tpu.memory_space<vmem>>, %arg2: memref<8x1xi32, #tpu.memory_space<vmem>>, %arg3: memref<1x8x128xf32, #tpu.memory_space<vmem>>) attributes {dimension_semantics = [#tpu.dimension_semantics<parallel>], iteration_bounds = array<i64: 1>, scalar_prefetch = 0 : i64, scratch_operands = 0 : i64, tpu.core_type = #tpu.core_type<tc>, window_params = [{transform_indices = @transform_0, window_bounds = array<i64: 8, 32>}, {transform_indices = @transform_1, window_bounds = array<i64: 8, 1>}, {transform_indices = @transform_2, window_bounds = array<i64: 1, 8, 128>}]} {
    %c0 = arith.constant 0 : index
    %c0_0 = arith.constant 0 : index
    %0 = vector.load %arg1[%c0, %c0_0] : memref<8x32xf32, #tpu.memory_space<vmem>>, vector<8x32xf32>
    %c0_1 = arith.constant 0 : index
    %c0_2 = arith.constant 0 : index
    %1 = vector.load %arg2[%c0_1, %c0_2] : memref<8x1xi32, #tpu.memory_space<vmem>>, vector<8x1xi32>
    %cst = arith.constant dense<0xFF800000> : vector<8xf32>
    %2 = vector.multi_reduction <maximumf>, %0, %cst [1] : vector<8x32xf32> to vector<8xf32>
    %3 = vector.shape_cast %2 : vector<8xf32> to vector<8x1xf32>
    %cst_3 = arith.constant dense<0.000000e+00> : vector<8xf32>
    %4 = vector.multi_reduction <add>, %0, %cst_3 [1] : vector<8x32xf32> to vector<8xf32>
    %5 = vector.shape_cast %4 : vector<8xf32> to vector<8x1xf32>
    %6 = tpu.iota {dimensions = array<i32: 1>} : vector<8x32xi32>
    %7 = vector.broadcast %1 : vector<8x1xi32> to vector<8x32xi32>
    %8 = arith.cmpi eq, %6, %7 : vector<8x32xi32>
    %cst_4 = arith.constant 0.000000e+00 : f32
    %9 = vector.broadcast %cst_4 : f32 to vector<8x32xf32>
    %10 = arith.select %8, %0, %9 : vector<8x32xi1>, vector<8x32xf32>
    %cst_5 = arith.constant dense<0.000000e+00> : vector<8xf32>
    %11 = vector.multi_reduction <add>, %10, %cst_5 [1] : vector<8x32xf32> to vector<8xf32>
    %12 = vector.shape_cast %11 : vector<8xf32> to vector<8x1xf32>
    %13 = vector.broadcast %3 : vector<8x1xf32> to vector<8x32xf32>
    %14 = arith.subf %0, %13 : vector<8x32xf32>
    %15 = math.exp %14 : vector<8x32xf32>
    %cst_6 = arith.constant dense<0.000000e+00> : vector<8xf32>
    %16 = vector.multi_reduction <add>, %15, %cst_6 [1] : vector<8x32xf32> to vector<8xf32>
    %17 = vector.shape_cast %16 : vector<8xf32> to vector<8x1xf32>
    %18 = math.log %17 : vector<8x1xf32>
    %19 = arith.addf %3, %18 : vector<8x1xf32>
    %cst_7 = arith.constant 3.200000e+01 : f32
    %20 = vector.broadcast %cst_7 : f32 to vector<8x1xf32>
    %21 = arith.mulf %20, %19 : vector<8x1xf32>
    %22 = arith.subf %5, %21 : vector<8x1xf32>
    %23 = arith.subf %12, %19 : vector<8x1xf32>
    %cst_8 = arith.constant 0.0032258064 : f32
    %24 = vector.broadcast %cst_8 : f32 to vector<8x1xf32>
    %25 = arith.mulf %24, %22 : vector<8x1xf32>
    %cst_9 = arith.constant -0.668481708 : f32
    %26 = vector.broadcast %cst_9 : f32 to vector<8x1xf32>
    %27 = arith.subf %26, %25 : vector<8x1xf32>
    %cst_10 = arith.constant 0.896774172 : f32
    %28 = vector.broadcast %cst_10 : f32 to vector<8x1xf32>
    %29 = arith.mulf %28, %23 : vector<8x1xf32>
    %30 = arith.subf %27, %29 : vector<8x1xf32>
    %31 = tpu.iota {dimensions = array<i32: 0>} : vector<8x1xi32>
    %c8_i32 = arith.constant 8 : i32
    %32 = arith.muli %arg0, %c8_i32 : i32
    %33 = vector.broadcast %32 : i32 to vector<8x1xi32>
    %34 = arith.addi %31, %33 : vector<8x1xi32>
    %c8_i32_11 = arith.constant 8 : i32
    %35 = vector.broadcast %c8_i32_11 : i32 to vector<8x1xi32>
    %36 = arith.cmpi slt, %34, %35 : vector<8x1xi32>
    %cst_12 = arith.constant 0.000000e+00 : f32
    %37 = vector.broadcast %cst_12 : f32 to vector<8x1xf32>
    %38 = arith.select %36, %30, %37 : vector<8x1xi1>, vector<8x1xf32>
    %39 = vector.shape_cast %38 : vector<8x1xf32> to vector<1x8x1xf32>
    %cst_13 = arith.constant dense<0.000000e+00> : vector<1xf32>
    %40 = vector.multi_reduction <add>, %39, %cst_13 [1, 2] : vector<1x8x1xf32> to vector<1xf32>
    %41 = vector.shape_cast %40 : vector<1xf32> to vector<1x1x1xf32>
    %42 = vector.extract %41[0, 0, 0] : f32 from vector<1x1x1xf32>
    %43 = vector.broadcast %42 : f32 to vector<1x8x128xf32>
    %c0_14 = arith.constant 0 : index
    %c0_15 = arith.constant 0 : index
    %c0_16 = arith.constant 0 : index
    %44 = vector.load %arg3[%c0_14, %c0_15, %c0_16] : memref<1x8x128xf32, #tpu.memory_space<vmem>>, vector<1x8x128xf32>
    tpu.vector_store %arg3[%c0_14, %c0_15, %c0_16], %43 {strides = array<i32>} : memref<1x8x128xf32, #tpu.memory_space<vmem>>, vector<1x8x128xf32>,
    return
  }
  func.func @transform_0(%arg0: i32) -> (i32, i32) {
    %c0_i32 = arith.constant 0 : i32
    %c0_i32_0 = arith.constant 0 : i32
    return %arg0, %c0_i32 : i32, i32
  }
  func.func @transform_1(%arg0: i32) -> (i32, i32) {
    %c0_i32 = arith.constant 0 : i32
    %c0_i32_0 = arith.constant 0 : i32
    return %arg0, %c0_i32 : i32, i32
  }
  func.func @transform_2(%arg0: i32) -> (i32, i32, i32) {
    %c0_i32 = arith.constant 0 : i32
    %c0_i32_0 = arith.constant 0 : i32
    %c0_i32_1 = arith.constant 0 : i32
    return %arg0, %c0_i32, %c0_i32_0 : i32, i32, i32
  }
}

</mosaic_0001>

<bundles_post_ra>
// kernel: tpu_custom_call.1
= control target key start
LH: loop header
LB: loop body
LE: loop exit
PB: predicated region body
PF: predicated region fallthrough
CT: control target
= control target key end

     0   :  { %vm14_vm0 = vcmask 261120   ;;  %s153_s0 = inlined_call_operand.vmem [shape: f32[8,32], index: 0, kind: input, shape index: {}]   ;;  %s154_s1 = inlined_call_operand.vmem [shape: s32[8,1], index: 1, kind: input, shape index: {}]   ;;  %s155_s2 = inlined_call_operand.hbm [shape: f32[1,8,128], index: 2, kind: output, shape index: {}]  }
   0x1   :  { %v12_v0 = vld [vmem:[%s153_s0] sm:$0xff] }
   0x2   :  { %7 = vsyncpa [#allocation3], 0  ;;  %v15_v1 = vsel %vm14_vm0, %v12_v0, -inf  ;;  %v114_v2 = vmov 0   ;;  %v13_v3 = vld [vmem:[%s154_s1] sm:$0xff]  ;;  %v21_v7 = vlaneseq  ;;  %v18_v12 = vsel %vm14_vm0, %v12_v0, 0.0 }
   0x3   :  { %85 = vset.pattern.permute.xlu0 %v114_v2  ;;  %vm54_vm2 = vcmask 7168   ;;  %s115_s0 = smov [#allocation2]  }
   0x4   :  { %16 = vmax.xlane.f32.xlu0 %v15_v1  ;;  %v22_v8 = vand.u32 127, %v21_v7  ;;  %s73_s1 = sshll.u32 %s115_s0, 4  ;;  %s74_s1 = int_to_ptr.vmem [resolvable:$true] %s73_s1 }
   0x5   :  { %s90_s14 = scalar_lea.vmem %s74_s1, 128  ;;  %p95_p1 = scmp.lt.s32.totalorder %s74_s1, %s74_s1 }
   0x6   :  { %p91_p0 = scmp.ne.s32.totalorder %s74_s1, %s90_s14  ;;  %p96_p2 = scmp.lt.s32.totalorder %s90_s14, %s90_s14 }
   0x8   :  { %p97_p3 = por %p96_p2, %p95_p1 }
   0xa   :  { %p98_p4 = pnand %p97_p3, %p91_p0 }
  0x1a   :  { %24 = vperm.xlu0 %85, %v13_v3  }
  0x91   :  { %v17_v4 = vpop.xlane.xlu0 %16 }
  0x92   :  { %v31_v5 = vsub.f32 %v12_v0, %v17_v4 }
  0x94   :  { %v32_v6 = vmul.f32 1.442695, %v31_v5 }
  0x96   :  { %86 = vpow2.f32 %v32_v6 }
  0x99   :  { %v25_v9 = vpop.permute.xlu0 %24 }
  0x9a   :  { %vm26_vm1 = vcmp.eq.s32.totalorder %v22_v8, %v25_v9 }
  0x9b   :  { %v27_v13 = vsel %vm26_vm1, %v12_v0, 0.0 }
  0x9c   :  { %v28_v14 = vsel %vm14_vm0, %v27_v13, 0.0 }
  0xa0   :  { %v87_v10 = vpop.eup %86 }
  0xa1   :  { %v34_v11 = vsel %vm14_vm0, %v87_v10, 0.0 }
  0xa2   :  { %35 = vadd.xlane.f32.xlu1 %v34_v11 }
  0xa6   :  { %19 = vadd.xlane.f32.xlu1 %v18_v12 }
  0xaa   :  { %29 = vadd.xlane.f32.xlu1 %v28_v14 }
 0x12f   :  { %v36_v15 = vpop.xlane.xlu1 %35 }
 0x130   :  { %88 = vlog2.f32 %v36_v15 }
 0x133   :  { %v20_v16 = vpop.xlane.xlu1 %19 }
 0x137   :  { %v30_v20 = vpop.xlane.xlu1 %29 }
 0x13a   :  { %v89_v17 = vpop.eup %88 }
 0x13b   :  { %v38_v18 = vmul.f32 0.6931472, %v89_v17 }
 0x13d   :  { %v39_v19 = vadd.f32 %v38_v18, %v17_v4 }
 0x13f   :  { %v40_v21 = vmul.f32 32.0, %v39_v19  ;;  %v42_v23 = vsub.f32 %v30_v20, %v39_v19 }
 0x141   :  { %v41_v22 = vsub.f32 %v20_v16, %v40_v21  ;;  %v45_v26 = vmul.f32 0.8967742, %v42_v23 }
 0x143   :  { %v43_v24 = vmul.f32 0.0032258064, %v41_v22 }
 0x145   :  { %v44_v25 = vsub.f32 -0.6684817, %v43_v24 }
 0x147   :  { %v46_v27 = vsub.f32 %v44_v25, %v45_v26 }
 0x149   :  { %v55_v28 = vsel %vm54_vm2, %v46_v27, 0.0 }
 0x14a   :  { %56 = vadd.xlane.f32.xlu1 %v55_v28 }
 0x1d7   :  { %v57_v29 = vpop.xlane.xlu1 %56 }
 0x1d8   :  { %v58_v30 = vrot.slane %v57_v29, 4 }
 0x1da   :  { %v59_v31 = vadd.f32 %v58_v30, %v57_v29 }
 0x1dc   :  { %v60_v32 = vrot.slane %v59_v31, 2 }
 0x1de   :  { %v61_v33 = vadd.f32 %v60_v32, %v59_v31 }
 0x1e0   :  { %v62_v34 = vrot.slane %v61_v33, 1 }
 0x1e2   :  { %v63_v35 = vadd.f32 %v62_v34, %v61_v33 }
 0x1e4   :  { %81 = vpush %v63_v35 }
 0x215   :  { %s82_s13 = spop %81 }
 0x216   :  { %v65_v36 = vstv %s82_s13 }
 0x217   :  { %66 = vst [vmem:[#allocation2] sm:$0xff] %v65_v36 }
 0x218   :  { %101 = shalt.err (!%p98_p4)
}
 0x219   :  { %s102_s17 = scalar_lea.hbm %s155_s2, 128 }
 0x21a   :  { %p103_p5 = scmp.ne.s32.totalorder %s155_s2, %s102_s17  ;;  %p106_p6 = scmp.lt.u32.totalorder %s102_s17, %s155_s2 }
 0x21c   :  { %p108_p7 = pnand %p106_p6, %p103_p5 }
 0x21e   :  { %111 = shalt.err (!%p108_p7)
}
 0x21f   :  { %76 = dma.vmem_to_hbm [thread:$0]  %s74_s1, 128, %s155_s2, [#allocation3]  }
 0x220   :  { %112 = dma.done.wait [#allocation3], 128  }
 0x221   :  { %113 = vsyncadd [#allocation3], 4294967168 }
 0x222   :  { %80 = vsyncpa [#allocation3], 1 }

</bundles_post_ra>
